<compile_context>
chip_gen: v5e
topology: v5e:2x2
jax: 0.10.0
libtpu: 0.0.40
codegen_flags: <defaults>
</compile_context>

<pallas_src>
import functools

import numpy as np

import jax
import jax.numpy as jnp
from jax.experimental import pallas as pl
from jax.experimental.pallas import tpu as pltpu


# ------------------------------ Pallas kernel --------------------------------
def _ppl_kernel(p_ref, x_ref, o_ref):
    """One grid step = one (layer, image, channel-tile) block.

    p_ref: (HWp, HWp) host-composed pooling matrix for layer l (already
           transposed so rows act from the right).
    x_ref: (TC, HWp)  one channel-tile of one image, flattened spatially.
    o_ref: (TC, HWp)  layer-l pooled output for the same rows.
    """
    o_ref[...] = jnp.dot(
        x_ref[...], p_ref[...], preferred_element_type=jnp.float32
    ).astype(o_ref.dtype)


# ------------------------------ host-side setup -------------------------------
def _avg_band(size, k):
    """1-D stride-1 'same' avg-pool matrix (zero pad, count_include_pad=True)."""
    pad = (k - 1) // 2
    i = np.arange(size)[:, None]
    j = np.arange(size)[None, :]
    band = (j >= i - pad) & (j <= i - pad + k - 1)
    return band.astype(np.float64) / float(k)


def _round_up(x, m):
    return (x + m - 1) // m * m


def _composed_pooling_matrices(H, W, kernel_sizes, HWp):
    """P[l] = (A_l ... A_1)^T, zero-padded to (HWp, HWp).

    Composed in float64 (then cast to f32) so compounded rounding across the L
    chained pools does not eat into the 1e-4 tolerance.  Zero padding is
    mathematically inert.
    """
    HW = H * W
    L = len(kernel_sizes)
    P = np.zeros((L, HWp, HWp), np.float32)
    comp = np.eye(HW, dtype=np.float64)
    for l, k in enumerate(kernel_sizes):
        A = np.kron(_avg_band(H, k), _avg_band(W, k))   # float64, (HW, HW)
        comp = A @ comp                                 # A_l ... A_1
        P[l, :HW, :HW] = comp.T.astype(np.float32)
    return P


def pyramid_pooling_block(x_nchw, kernel_sizes, stride=1):
    """_PyramidPoolingBlock.forward (intended semantics), NCHW in / NCHW out."""
    if stride != 1:
        raise NotImplementedError(
            "'same' pooling + channel concat requires stride == 1")
    N, C, H, W = x_nchw.shape
    L = len(kernel_sizes)
    HW = H * W
    HWp = _round_up(HW, 128)

    # Channel tile: full C if small (block == full dim satisfies the (8,128)
    # rule), otherwise 256-row tiles; partial last blocks are clipped by Pallas.
    TC = C if C <= 256 else 256
    CB = pl.cdiv(C, TC)

    x = x_nchw.reshape(N, C, HW).astype(jnp.float32)
    if HWp != HW:
        # Lane padding must be explicit zeros: uninitialized OOB lanes could be
        # NaN and NaN * 0 would poison the contraction.
        x = jnp.pad(x, ((0, 0), (0, 0), (0, HWp - HW)))

    P = jnp.asarray(_composed_pooling_matrices(H, W, kernel_sizes, HWp))

    # Double-buffered f32 tiles: P (HWp x HWp) + x/out (TC x HWp) each.
    vmem_need = 2 * 4 * (HWp * HWp + 2 * TC * HWp)
    vmem_limit = min(max(2 * vmem_need, 16 * 1024 * 1024), 64 * 1024 * 1024)

    out = pl.pallas_call(
        _ppl_kernel,
        out_shape=jax.ShapeDtypeStruct((N, L, C, HWp), jnp.float32),
        grid_spec=pltpu.PrefetchScalarGridSpec(
            num_scalar_prefetch=0,
            grid=(L, N, CB),
            in_specs=[
                # Pooling matrix: constant block index over inner axes -> it is
                # DMA'd once per layer and stays resident in VMEM.
                pl.BlockSpec((None, HWp, HWp), lambda l, n, cb: (l, 0, 0)),
                # Activation tile: streams over (image, channel-block).
                pl.BlockSpec((None, TC, HWp), lambda l, n, cb: (n, cb, 0)),
            ],
            # Concatenated layout written directly: (n, l, c, hw).
            out_specs=pl.BlockSpec((None, None, TC, HWp),
                                   lambda l, n, cb: (n, l, cb, 0)),
        ),
        compiler_params=pltpu.CompilerParams(
            dimension_semantics=("arbitrary", "parallel", "parallel"),
            vmem_limit_bytes=vmem_limit),
    )(P, x)

    if HWp != HW:
        out = out[..., :HW]
    # (N, L, C, H*W) -> (N, L*C, H, W): pure reshape, no transpose / HBM copy.
    return out.reshape(N, L * C, H, W)


# ----------------------- pure-JAX reference (for checking) -------------------
def _ref_pyramid_pooling(x_nchw, kernel_sizes):
    outs, cur = [], x_nchw
    for k in kernel_sizes:
        lo, hi = (k - 1) // 2, k // 2
        s = jax.lax.reduce_window(
            cur, 0.0, jax.lax.add,
            window_dimensions=(1, 1, k, k), window_strides=(1, 1, 1, 1),
            padding=((0, 0), (0, 0), (lo, hi), (lo, hi)))
        cur = s / float(k * k)                 # count_include_pad=True divisor
        outs.append(cur)
    return jnp.concatenate(outs, axis=1)


# ---------------------------------- main --------------------------------------
if __name__ == "__main__":
    N, C, H, W = 2, 4, 16, 16
    kernel_sizes = (3, 5, 7)   # pyramid of 'same' average pools, stride 1

    key = jax.random.PRNGKey(0)
    x = jax.random.normal(key, (N, C, H, W), dtype=jnp.float32)

    fn = jax.jit(functools.partial(pyramid_pooling_block,
                                   kernel_sizes=kernel_sizes, stride=1))
    out = fn(x)
    jax.block_until_ready(out)

    assert out.shape == (N, len(kernel_sizes) * C, H, W)

    ref = _ref_pyramid_pooling(x, kernel_sizes)
    max_err = float(jnp.max(jnp.abs(out - ref)))
    assert jnp.allclose(out, ref, rtol=1e-4, atol=1e-4), max_err

    print("KERNEL_OK")
</pallas_src>

<mosaic_0001>
module attributes {stable_mosaic.version = 11 : i64} {
  func.func @_ppl_kernel(%arg0: i32, %arg1: i32, %arg2: i32, %arg3: memref<1x256x256xf32, #tpu.memory_space<vmem>>, %arg4: memref<1x4x256xf32, #tpu.memory_space<vmem>>, %arg5: memref<1x1x4x256xf32, #tpu.memory_space<vmem>>) attributes {dimension_semantics = [#tpu.dimension_semantics<arbitrary>, #tpu.dimension_semantics<parallel>, #tpu.dimension_semantics<parallel>], iteration_bounds = array<i64: 3, 2, 1>, scalar_prefetch = 0 : i64, scratch_operands = 0 : i64, tpu.core_type = #tpu.core_type<tc>, window_params = [{transform_indices = @transform_0, window_bounds = array<i64: 1, 256, 256>}, {transform_indices = @transform_1, window_bounds = array<i64: 1, 4, 256>}, {transform_indices = @transform_2, window_bounds = array<i64: 1, 1, 4, 256>}]} {
    %c0 = arith.constant 0 : index
    %c0_0 = arith.constant 0 : index
    %c0_1 = arith.constant 0 : index
    %0 = vector.load %arg4[%c0, %c0_0, %c0_1] : memref<1x4x256xf32, #tpu.memory_space<vmem>>, vector<1x4x256xf32>
    %1 = vector.shape_cast %0 : vector<1x4x256xf32> to vector<4x256xf32>
    %c0_2 = arith.constant 0 : index
    %c0_3 = arith.constant 0 : index
    %c0_4 = arith.constant 0 : index
    %2 = vector.load %arg3[%c0_2, %c0_3, %c0_4] : memref<1x256x256xf32, #tpu.memory_space<vmem>>, vector<1x256x256xf32>
    %3 = vector.shape_cast %2 : vector<1x256x256xf32> to vector<256x256xf32>
    %cst = arith.constant dense<0.000000e+00> : vector<4x256xf32>
    %4 = tpu.matmul %1, %3, %cst {dimension_numbers = #tpu.dot_dimension_numbers<[1], [0], [0], [1], [0, 0, 1, 1], [], []>} : vector<4x256xf32>, vector<256x256xf32>, vector<4x256xf32> -> vector<4x256xf32>
    %c0_5 = arith.constant 0 : index
    %c0_6 = arith.constant 0 : index
    %c0_7 = arith.constant 0 : index
    %c0_8 = arith.constant 0 : index
    %5 = vector.load %arg5[%c0_5, %c0_6, %c0_7, %c0_8] : memref<1x1x4x256xf32, #tpu.memory_space<vmem>>, vector<1x1x4x256xf32>
    %6 = vector.shape_cast %5 : vector<1x1x4x256xf32> to vector<4x256xf32>
    %7 = vector.shape_cast %4 : vector<4x256xf32> to vector<1x1x4x256xf32>
    tpu.vector_store %arg5[%c0_5, %c0_6, %c0_7, %c0_8], %7 {strides = array<i32>} : memref<1x1x4x256xf32, #tpu.memory_space<vmem>>, vector<1x1x4x256xf32>,
    return
  }
  func.func @transform_0(%arg0: i32, %arg1: i32, %arg2: i32) -> (i32, i32, i32) {
    %c0_i32 = arith.constant 0 : i32
    %c0_i32_0 = arith.constant 0 : i32
    %c0_i32_1 = arith.constant 0 : i32
    return %arg0, %c0_i32, %c0_i32_0 : i32, i32, i32
  }
  func.func @transform_1(%arg0: i32, %arg1: i32, %arg2: i32) -> (i32, i32, i32) {
    %c0_i32 = arith.constant 0 : i32
    %c0_i32_0 = arith.constant 0 : i32
    return %arg1, %arg2, %c0_i32 : i32, i32, i32
  }
  func.func @transform_2(%arg0: i32, %arg1: i32, %arg2: i32) -> (i32, i32, i32, i32) {
    %c0_i32 = arith.constant 0 : i32
    %c0_i32_0 = arith.constant 0 : i32
    return %arg1, %arg0, %arg2, %c0_i32 : i32, i32, i32, i32
  }
}

</mosaic_0001>

<bundles_post_ra>
// kernel: pyramid_pooling_block.1
= control target key start
LH: loop header
LB: loop body
LE: loop exit
PB: predicated region body
PF: predicated region fallthrough
CT: control target
= control target key end

     0   :  { %7 = vsyncpa [#allocation3], 0  ;;  %s928_s0 = inlined_call_operand.hbm [shape: f32[3,256,256], index: 0, kind: input, shape index: {}]   ;;  %s929_s1 = inlined_call_operand.vmem [shape: f32[2,4,256], index: 1, kind: input, shape index: {}]   ;;  %s930_s2 = inlined_call_operand.vmem [shape: f32[2,3,4,256], index: 2, kind: output, shape index: {}]  }
   0x1   :  { %9 = vsyncpa [#allocation3 + $0x1], 0  ;;  %s741_s9 = smov 0   ;;  %s743_s10 = smov 0  }
   0x2   :  { %s745_s11 = smov 0   ;;  %s747_s12 = smov 0  }
   0x3   :  { %s749_s13 = smov 0   ;;  %s751_s14 = smov 0  }
   0x4   :  { %s753_s15 = smov 0   ;;  %s755_s16 = smov 0  }
   0x5 LB: > { %s535_s17 = sadd.s32 4294967295, %s722_s16   ;;  %s30_s18 = sadd.s32 1, %s714_s14  ;;  %s722_s16 = sphi %s755_s16, %s15_s16   ;;  %s718_s15 = sphi %s753_s15, %s939_s15   ;;  %s714_s14 = sphi %s751_s14, %s938_s14   ;;  %s710_s13 = sphi %s749_s13, %s937_s13   ;;  %s706_s12 = sphi %s747_s12, %s936_s12   ;;  %s702_s11 = sphi %s745_s11, %s935_s11   ;;  %s698_s10 = sphi %s743_s10, %s934_s10   ;;  %s694_s9 = sphi %s741_s9, %s933_s9  }
   0x6   : > { %p32_p0 = scmp.ge.s32.totalorder %s30_s18, 2  ;;  %s34_s19 = sadd.s32 1, %s718_s15 }
   0x7   : > { %s41_s20 = sadd.s32 1, %s702_s11  ;;  %p48_p1 = scmp.ne.s32.totalorder %s702_s11, %s698_s10 }
   0x8   : > { %s941_s18 = smov (%p32_p0, %s30_s18), 0  ;;  %s943_s19 = smov (!%p32_p0, %s34_s19), %s718_s15 }
   0x9   : > { %p49_p2 = scmp.eq.s32.totalorder %s722_s16, 0  ;;  %p54_p3 = scmp.ne.s32.totalorder %s698_s10, %s694_s9 }
   0xa   : > { %p36_p4 = scmp.ge.s32.totalorder %s943_s19, 3  ;;  %p55_p5 = scmp.eq.s32.totalorder %s535_s17, 0 }
   0xb   : > { %p790_p6 = por %p49_p2, %p48_p1  ;;  %p559_p8 = scmp.lt.s32.totalorder %s722_s16, 6 }
   0xc   : > { %s945_s19 = smov (%p36_p4, %s943_s19), 0  ;;  %p796_p7 = por %p55_p5, %p54_p3 }
   0xd   : > { %s38_s23 = ssub.s32 %s718_s15, %s945_s19  ;;  %s136_s24 = sand.u32 1, %s702_s11  }
   0xe   : > { %p39_p9 = scmp.eq.s32.totalorder %s38_s23, 0  ;;  %s539_s25 = sshll.u32 %s136_s24, 9 }
   0xf   : > { %s550_s26 = sshll.u32 %s718_s15, 9  ;;  %s140_s4 = scalar_lea.vmem [#allocation2], %s539_s25 }
  0x10   : > { %s806_s27 = scalar_select %p39_p9, %s702_s11, %s41_s20  }
  0x11   : > { %s145_s30 = scalar_lea.hbm %s928_s0, %s550_s26  ;;  %s148_s5 = sshll.u32 %s140_s4, 4  ;;  %s149_s5 = int_to_ptr.vmem [resolvable:$true] %s148_s5 }
  0x12   : > { %s146_s3 = sshll.u32 %s145_s30, 4  ;;  %p556_p10 = pnand %p559_p8, %p790_p6  ;;  %s147_s3 = int_to_ptr.hbm [resolvable:$true] %s146_s3 }
  0x13   : > { %p542_p11 = scmp.ge.s32.totalorder %s722_s16, 1  ;;  %p168_p12 = scmp.lt.s32.totalorder %s722_s16, 7 }
  0x14   : > { %s137_s6 = scalar_lea.sflag [#allocation3], %s136_s24  ;;  %s724_s7 = smov 256  }
  0x15   : > { %s725_s8 = smov 16   ;;  %p169_p13 = pnand %p542_p11, %p168_p12 }
  0x16   : > { %558 = dma.hbm_to_vmem [thread:$0]  (!%p556_p10), %s147_s3, 8192, %s149_s5, %s137_s6, %s724_s7, %s724_s7, %s725_s8  }
  0x17   : > { %172 = sbr.rel (%p169_p13) target bundleno = 200 (0xc8), region = 28  ;;  %s174_s9 = sand.u32 (!%p169_p13), 1, %s698_s10  }
  0x18   : > { %s543_s17 = sshll.u32 (!%p169_p13), %s174_s9, 9  ;;  %s175_s20 = scalar_lea.sflag (!%p169_p13), [#allocation3], %s174_s9 }
  0x19   : > { %s818_s23 = scalar_lea.vmem (!%p169_p13), [#allocation2], %s543_s17 }
  0x1c   : > { %689 = dma.done.wait (%p796_p7), %s175_s20, 8192  }
  0x1d   : > { %691 = vsyncadd (%p796_p7), %s175_s20, 4294959104  ;;  %v271_v0 = vld [vmem:[%s818_s23 + $0xf8] sm:$0xff]  ;;  %v269_v2 = vld [vmem:[%s818_s23 + $0xe8] sm:$0xff]  ;;  %p217_p0 = scmp.lt.s32.totalorder %s706_s12, 1  ;;  %p228_p1 = scmp.lt.s32.totalorder %s710_s13, 2  ;;  %vm393_vm0 = vcmask 1043456  }
  0x1e   : > { %v303_v1 = vld [vmem:[%s818_s23 + $0x1f8] sm:$0xff]  ;;  %350 = vmatpush.msra.mxu2 %v271_v0  ;;  %v301_v3 = vld [vmem:[%s818_s23 + $0x1e8] sm:$0xff]  ;;  %v270_v6 = vld [vmem:[%s818_s23 + $0xf0] sm:$0xff] }
  0x1f   : > { %370 = vmatpush.msra.mxu3 %v303_v1  ;;  %v267_v4 = vld [vmem:[%s818_s23 + $0xd8] sm:$0xff]  ;;  %v265_v7 = vld [vmem:[%s818_s23 + $0xc8] sm:$0xff]  ;;  %v302_v8 = vld [vmem:[%s818_s23 + $0x1f0] sm:$0xff]  ;;  %310 = vmatpush.msra.mxu0 %v270_v6  ;;  %s947_s12 = smov (!%p217_p0, %s706_s12), 1  ;;  %s949_s13 = smov (!%p228_p1, %s710_s13), 2 }
  0x20   : > { %v299_v5 = vld [vmem:[%s818_s23 + $0x1d8] sm:$0xff]  ;;  %351 = vmatpush.msra.mxu2 %v269_v2  ;;  %v297_v9 = vld [vmem:[%s818_s23 + $0x1c8] sm:$0xff]  ;;  %330 = vmatpush.msra.mxu1 %v302_v8  ;;  %v268_v10 = vld [vmem:[%s818_s23 + $0xe0] sm:$0xff]  ;;  %s551_s21 = sshll.u32 %s947_s12, 3  ;;  %s552_s26 = smul.u32 6, %s947_s12 }
  0x21   : > { %371 = vmatpush.msra.mxu3 %v301_v3  ;;  %v300_v11 = vld [vmem:[%s818_s23 + $0x1e0] sm:$0xff]  ;;  %v266_v12 = vld [vmem:[%s818_s23 + $0xd0] sm:$0xff]  ;;  %v263_v14 = vld [vmem:[%s818_s23 + $0xb8] sm:$0xff]  ;;  %311 = vmatpush.msra.mxu0 %v268_v10  ;;  %s225_s25 = scalar_lea.vmem %s929_s1, %s551_s21  ;;  %s546_s28 = sshll.u32 %s949_s13, 1 }
  0x22   : > { %352 = vmatpush.msra.mxu2 %v267_v4  ;;  %v298_v13 = vld [vmem:[%s818_s23 + $0x1d0] sm:$0xff]  ;;  %v295_v15 = vld [vmem:[%s818_s23 + $0x1b8] sm:$0xff]  ;;  %331 = vmatpush.msra.mxu1 %v300_v11  ;;  %v264_v16 = vld [vmem:[%s818_s23 + $0xc0] sm:$0xff]  ;;  %s236_s29 = sadd.s32 %s552_s26, %s546_s28 }
  0x23   : > { %372 = vmatpush.msra.mxu3 %v299_v5  ;;  %v296_v17 = vld [vmem:[%s818_s23 + $0x1c0] sm:$0xff]  ;;  %v261_v18 = vld [vmem:[%s818_s23 + $0xa8] sm:$0xff]  ;;  %312 = vmatpush.msra.mxu0 %v266_v12  ;;  %v262_v20 = vld [vmem:[%s818_s23 + $0xb0] sm:$0xff]  ;;  %s547_s30 = sshll.u32 %s236_s29, 2 }
  0x24   : > { %353 = vmatpush.msra.mxu2 %v265_v7  ;;  %v293_v19 = vld [vmem:[%s818_s23 + $0x1a8] sm:$0xff]  ;;  %332 = vmatpush.msra.mxu1 %v298_v13  ;;  %v294_v21 = vld [vmem:[%s818_s23 + $0x1b0] sm:$0xff]  ;;  %v259_v22 = vld [vmem:[%s818_s23 + $0x98] sm:$0xff]  ;;  %s238_s5 = scalar_lea.vmem %s930_s2, %s547_s30 }
  0x25   : > { %373 = vmatpush.msra.mxu3 %v297_v9  ;;  %v291_v23 = vld [vmem:[%s818_s23 + $0x198] sm:$0xff]  ;;  %313 = vmatpush.msra.mxu0 %v264_v16  ;;  %v260_v24 = vld [vmem:[%s818_s23 + $0xa0] sm:$0xff]  ;;  %v257_v26 = vld [vmem:[%s818_s23 + $0x88] sm:$0xff] }
  0x26   : > { %354 = vmatpush.msra.mxu2 %v263_v14  ;;  %333 = vmatpush.msra.mxu1 %v296_v17  ;;  %v292_v25 = vld [vmem:[%s818_s23 + $0x1a0] sm:$0xff]  ;;  %v289_v27 = vld [vmem:[%s818_s23 + $0x188] sm:$0xff]  ;;  %v258_v28 = vld [vmem:[%s818_s23 + $0x90] sm:$0xff] }
  0x27   : > { %374 = vmatpush.msra.mxu3 %v295_v15  ;;  %314 = vmatpush.msra.mxu0 %v262_v20  ;;  %v290_v29 = vld [vmem:[%s818_s23 + $0x190] sm:$0xff]  ;;  %v255_v30 = vld [vmem:[%s818_s23 + $0x78] sm:$0xff]  ;;  %v256_v32 = vld [vmem:[%s818_s23 + $0x80] sm:$0xff] }
  0x28   : > { %355 = vmatpush.msra.mxu2 %v261_v18  ;;  %334 = vmatpush.msra.mxu1 %v294_v21  ;;  %v287_v31 = vld [vmem:[%s818_s23 + $0x178] sm:$0xff]  ;;  %v288_v33 = vld [vmem:[%s818_s23 + $0x180] sm:$0xff]  ;;  %v253_v34 = vld [vmem:[%s818_s23 + $0x68] sm:$0xff] }
  0x29   : > { %375 = vmatpush.msra.mxu3 %v293_v19  ;;  %315 = vmatpush.msra.mxu0 %v260_v24  ;;  %v285_v35 = vld [vmem:[%s818_s23 + $0x168] sm:$0xff]  ;;  %v254_v36 = vld [vmem:[%s818_s23 + $0x70] sm:$0xff]  ;;  %v251_v38 = vld [vmem:[%s818_s23 + $0x58] sm:$0xff] }
  0x2a   : > { %356 = vmatpush.msra.mxu2 %v259_v22  ;;  %335 = vmatpush.msra.mxu1 %v292_v25  ;;  %v286_v37 = vld [vmem:[%s818_s23 + $0x170] sm:$0xff]  ;;  %v283_v39 = vld [vmem:[%s818_s23 + $0x158] sm:$0xff]  ;;  %v252_v41 = vld [vmem:[%s818_s23 + $0x60] sm:$0xff] }
  0x2b   : > { %376 = vmatpush.msra.mxu3 %v291_v23  ;;  %316 = vmatpush.msra.mxu0 %v258_v28  ;;  %v239_v40 = vld [vmem:[%s225_s25] sm:$0xff]  ;;  %v284_v42 = vld [vmem:[%s818_s23 + $0x160] sm:$0xff]  ;;  %v249_v43 = vld [vmem:[%s818_s23 + $0x48] sm:$0xff] }
  0x2c   : > { %357 = vmatpush.msra.mxu2 %v257_v26  ;;  %336 = vmatpush.msra.mxu1 %v290_v29  ;;  %305 = vst [vmem:[#allocation1] ss:$2 sm:$0xff] %v239_v40  ;;  %v281_v44 = vld [vmem:[%s818_s23 + $0x148] sm:$0xff]  ;;  %v250_v45 = vld [vmem:[%s818_s23 + $0x50] sm:$0xff]  ;;  %v247_v47 = vld [vmem:[%s818_s23 + $0x38] sm:$0xff] }
  0x2d   : > { %377 = vmatpush.msra.mxu3 %v289_v27  ;;  %317 = vmatpush.msra.mxu0 %v256_v32  ;;  %v282_v46 = vld [vmem:[%s818_s23 + $0x150] sm:$0xff]  ;;  %v279_v48 = vld [vmem:[%s818_s23 + $0x138] sm:$0xff]  ;;  %v248_v49 = vld [vmem:[%s818_s23 + $0x40] sm:$0xff] }
  0x2e   : > { %358 = vmatpush.msra.mxu2 %v255_v30  ;;  %337 = vmatpush.msra.mxu1 %v288_v33  ;;  %v280_v50 = vld [vmem:[%s818_s23 + $0x140] sm:$0xff]  ;;  %v245_v51 = vld [vmem:[%s818_s23 + $0x28] sm:$0xff]  ;;  %v246_v53 = vld [vmem:[%s818_s23 + $0x30] sm:$0xff] }
  0x2f   : > { %378 = vmatpush.msra.mxu3 %v287_v31  ;;  %318 = vmatpush.msra.mxu0 %v254_v36  ;;  %v277_v52 = vld [vmem:[%s818_s23 + $0x128] sm:$0xff]  ;;  %v278_v54 = vld [vmem:[%s818_s23 + $0x130] sm:$0xff]  ;;  %v243_v55 = vld [vmem:[%s818_s23 + $0x18] sm:$0xff] }
  0x30   : > { %359 = vmatpush.msra.mxu2 %v253_v34  ;;  %338 = vmatpush.msra.mxu1 %v286_v37  ;;  %v275_v56 = vld [vmem:[%s818_s23 + $0x118] sm:$0xff]  ;;  %v244_v57 = vld [vmem:[%s818_s23 + $0x20] sm:$0xff]  ;;  %v241_v59 = vld [vmem:[%s818_s23 + $0x8] sm:$0xff] }
  0x31   : > { %379 = vmatpush.msra.mxu3 %v285_v35  ;;  %319 = vmatpush.msra.mxu0 %v252_v41  ;;  %v276_v58 = vld [vmem:[%s818_s23 + $0x120] sm:$0xff]  ;;  %v273_v60 = vld [vmem:[%s818_s23 + $0x108] sm:$0xff]  ;;  %v242_v63 = vld [vmem:[%s818_s23 + $0x10] sm:$0xff] }
  0x32   : > { %360 = vmatpush.msra.mxu2 %v251_v38  ;;  %339 = vmatpush.msra.mxu1 %v284_v42  ;;  %v274_v0 = vld [vmem:[%s818_s23 + $0x110] sm:$0xff]  ;;  %v240_v1 = vld [vmem:[%s818_s23] sm:$0xff] }
  0x33   : > { %380 = vmatpush.msra.mxu3 %v283_v39  ;;  %320 = vmatpush.msra.mxu0 %v250_v45  ;;  %v306_v61 = vld.sshfl [vmem:[#allocation1] sm:$0xff pattern:$0x75316420]  ;;  %v307_v62 = vld.sshfl [vmem:[#allocation1 + $0x8] sm:$0xff pattern:$0x75316420] }
  0x34   : > { %361 = vmatpush.msra.mxu2 %v249_v43  ;;  %340 = vmatpush.msra.mxu1 %v282_v46  ;;  %v272_v2 = vld [vmem:[%s818_s23 + $0x100] sm:$0xff] }
  0x35   : > { %381 = vmatpush.msra.mxu3 %v281_v44  ;;  %321 = vmatpush.msra.mxu0 %v248_v49 }
  0x36   : > { %362 = vmatpush.msra.mxu2 %v247_v47  ;;  %341 = vmatpush.msra.mxu1 %v280_v50 }
  0x37   : > { %382 = vmatpush.msra.mxu3 %v279_v48  ;;  %322 = vmatpush.msra.mxu0 %v246_v53 }
  0x38   : > { %363 = vmatpush.msra.mxu2 %v245_v51  ;;  %342 = vmatpush.msra.mxu1 %v278_v54 }
  0x39   : > { %383 = vmatpush.msra.mxu3 %v277_v52  ;;  %323 = vmatpush.msra.mxu0 %v244_v57 }
  0x3a   : > { %364 = vmatpush.msra.mxu2 %v243_v55  ;;  %343 = vmatpush.msra.mxu1 %v276_v58 }
  0x3b   : > { %384 = vmatpush.msra.mxu3 %v275_v56  ;;  %324 = vmatpush.msra.mxu0 %v242_v63 }
  0x3c   : > { %365 = vmatpush.msra.mxu2 %v241_v59  ;;  %344 = vmatpush.msra.mxu1 %v274_v0 }
  0x3d   : > { %385 = vmatpush.msra.mxu3 %v273_v60  ;;  %366 = vmatmul.f32.vlgmr.msra.gmra.mxu2 %v306_v61 }
  0x3e   : > { %386 = vmatmul.f32.vlgmr.msra.gmra.mxu3 %v307_v62  ;;  %325 = vmatpush.msra.mxu0 %v240_v1 }
  0x3f   : > { %345 = vmatpush.msra.mxu1 %v272_v2  ;;  %326 = vmatmul.f32.vlgmr.msra.gmra.mxu0 %v306_v61 }
  0x40   : > { %346 = vmatmul.f32.vlgmr.msra.gmra.mxu1 %v307_v62 }
  0xbc   : > { %v327_v3 = vpop.f32.mrf.mxu0 }
  0xbd   : > { %v347_v4 = vpop.f32.mrf.mxu1 }
  0xbe   : > { %v348_v8 = vadd.f32 %v347_v4, %v327_v3 }
  0xc0   : > { %v367_v5 = vpop.f32.mrf.mxu2 }
  0xc1   : > { %v387_v6 = vpop.f32.mrf.mxu3 }
  0xc2   : > { %v388_v7 = vadd.f32 %v387_v6, %v367_v5 }
  0xc4   : > { %v392_v9 = vrot.slane %v388_v7, 4 }
  0xc6   : > { %v394_v10 = vsel %vm393_vm0, %v348_v8, %v392_v9 }
  0xc7   : > { %396 = vst [vmem:[%s238_s5] sm:$0xff] %v394_v10 }
  0xc8 PF: > { %s15_s16 = sadd.s32 1, %s722_s16   ;;  %s933_s9 = smov %s698_s10 }
  0xc9   : > { %p12_p2 = scmp.ge.s32.totalorder %s15_s16, 8   ;;  %s934_s10 = smov %s702_s11 }
  0xca   : > { %s935_s11 = smov %s806_s27  ;;  %s936_s12 = smov %s714_s14 }
  0xcb   : > { %s937_s13 = smov %s718_s15  ;;  %s938_s14 = smov %s941_s18 }
  0xcc   : > { %s939_s15 = smov %s945_s19  ;;  %14 = sbr.rel (!%p12_p2) target bundleno = 5 (0x5), region = 71 }
  0xd1   :  { %434 = vsyncpa [#allocation3], 1 }
  0xd2   :  { %436 = vsyncpa [#allocation3 + $0x1], 1 }

</bundles_post_ra>
